<compile_context>
chip_gen: v7x
topology: tpu7x:2x2x1
jax: 0.10.0
libtpu: 0.0.40
codegen_flags: <defaults>
</compile_context>

<pallas_src>
import jax
import jax.numpy as jnp
from jax.experimental import pallas as pl
from jax.experimental.pallas import tpu as pltpu


def _neg_fill_value(dtype):
    """Identity element for max() in the given dtype."""
    if jnp.issubdtype(dtype, jnp.floating):
        return float("-inf")
    return int(jnp.iinfo(dtype).min)


def _make_max_prob_kernel(N, tn, neg):
    needs_mask = (N % tn) != 0

    def kernel(x_ref, acc_ref):
        k = pl.program_id(1)  # reduction-axis grid position (last axis)

        @pl.when(k == 0)
        def _():
            acc_ref[...] = jnp.full(acc_ref.shape, neg, dtype=acc_ref.dtype)

        x = x_ref[...]  # (bt, tn, C) tile in VMEM

        if needs_mask:
            # Tail tile extends past N; mask invalid boxes with the max
            # identity.  Cheap VPU compare/select; kernel is HBM-bound.
            box = jax.lax.broadcasted_iota(jnp.int32, x.shape, dimension=1)
            valid = (k * tn + box) < N
            x = jnp.where(valid, x, neg)

        # Reduce over the box (sublane) axis, keep classes in lanes.
        tile_max = jnp.max(x, axis=1)  # (bt, C)
        acc_ref[...] = jnp.maximum(acc_ref[...], tile_max)

    return kernel


def max_prob_extractor(yolo_output, cls_id: int = 0, *, tn: int = 512, bt=None):
    """Pallas implementation of MaxProbExtractor.forward.

    yolo_output: [B, N, C] array. Returns [B] = max over boxes of class cls_id.
      tn: reduction (box-axis) tile size; clamped to a VMEM-safe multiple of 8.
      bt: batch tile size (set e.g. bt=1 on v7x to shard batch over both TCs);
          defaults to B (single batch tile).
    """
    B, N, C = yolo_output.shape
    dtype = yolo_output.dtype
    neg = _neg_fill_value(dtype)

    if bt is None:
        bt = B
    assert B % bt == 0, "batch tile must divide batch"

    itemsize = jnp.dtype(dtype).itemsize
    c_pad = ((C + 127) // 128) * 128  # lanes pad C to a multiple of 128

    # Pick the reduction tile: full extent if it fits in one step, otherwise a
    # multiple of 8; clamp so a double-buffered input tile stays well under the
    # default scoped-VMEM limits (16 MiB v5e, 32 MiB v6e/v7x, 64 MiB v7x phys).
    if tn >= N:
        tn = N
    else:
        tn = max(8, (tn // 8) * 8)
    max_tile_bytes = 12 << 20  # per input buffer (~24 MiB double-buffered)
    while tn > 8 and bt * tn * c_pad * itemsize > max_tile_bytes:
        tn = max(8, (tn // 2 // 8) * 8)

    n_steps = pl.cdiv(N, tn)
    grid_b = B // bt

    tile_bytes = bt * tn * c_pad * itemsize
    vmem_bytes = int(min(max(3 * tile_bytes + (2 << 20), 16 << 20), 48 << 20))

    acc = pl.pallas_call(
        _make_max_prob_kernel(N, tn, neg),
        out_shape=jax.ShapeDtypeStruct((B, C), dtype),
        grid_spec=pltpu.PrefetchScalarGridSpec(
            num_scalar_prefetch=0,
            grid=(grid_b, n_steps),  # reduction axis last
            in_specs=[pl.BlockSpec((bt, tn, C), lambda b, k: (b, k, 0))],
            # Constant index over k -> output block stays VMEM-resident
            # across the reduction (running-max accumulator).
            out_specs=pl.BlockSpec((bt, C), lambda b, k: (b, 0)),
        ),
        compiler_params=pltpu.CompilerParams(
            dimension_semantics=("parallel", "arbitrary"),
            vmem_limit_bytes=vmem_bytes,
        ),
    )(yolo_output)

    # Single lane-select of the attacked class, outside the kernel.
    return acc[:, cls_id]


if __name__ == "__main__":
    key = jax.random.PRNGKey(0)
    k1, k2 = jax.random.split(key)

    # Small YOLO-like output: batch=2, 512 candidate boxes, 80 class channels.
    B, N, C = 2, 512, 80
    cls_id = 0
    x = jax.random.normal(k1, (B, N, C), dtype=jnp.float32)

    out = jax.block_until_ready(max_prob_extractor(x, cls_id=cls_id))
    ref = jnp.max(x[:, :, cls_id], axis=1)
    assert out.shape == (B,)
    assert jnp.allclose(out, ref), (out, ref)

    # Ragged box count (typical YOLO N is not a multiple of the tile size):
    # exercises the cdiv grid + masked tail path.
    N2 = 500
    x2 = jax.random.normal(k2, (B, N2, C), dtype=jnp.float32)
    out2 = jax.block_until_ready(max_prob_extractor(x2, cls_id=7, tn=128))
    ref2 = jnp.max(x2[:, :, 7], axis=1)
    assert jnp.allclose(out2, ref2), (out2, ref2)

    print("KERNEL_OK")
</pallas_src>

<mosaic_0001>
module attributes {stable_mosaic.version = 11 : i64} {
  func.func @kernel(%arg0: i32, %arg1: i32, %arg2: memref<2x512x80xf32, #tpu.memory_space<vmem>>, %arg3: memref<2x80xf32, #tpu.memory_space<vmem>>) attributes {dimension_semantics = [#tpu.dimension_semantics<parallel>, #tpu.dimension_semantics<arbitrary>], iteration_bounds = array<i64: 1, 1>, scalar_prefetch = 0 : i64, scratch_operands = 0 : i64, tpu.core_type = #tpu.core_type<tc>, window_params = [{transform_indices = @transform_0, window_bounds = array<i64: 2, 512, 80>}, {transform_indices = @transform_1, window_bounds = array<i64: 2, 80>}]} {
    %c0_i32 = arith.constant 0 : i32
    %0 = arith.cmpi eq, %arg1, %c0_i32 : i32
    %1 = arith.extui %0 : i1 to i32
    %c0_i32_0 = arith.constant 0 : i32
    %2 = arith.cmpi ne, %1, %c0_i32_0 : i32
    scf.if %2 {
      %cst_7 = arith.constant 0xFF800000 : f32
      %8 = vector.broadcast %cst_7 : f32 to vector<2x80xf32>
      %c0_8 = arith.constant 0 : index
      %c0_9 = arith.constant 0 : index
      %9 = vector.load %arg3[%c0_8, %c0_9] : memref<2x80xf32, #tpu.memory_space<vmem>>, vector<2x80xf32>
      tpu.vector_store %arg3[%c0_8, %c0_9], %8 {strides = array<i32>} : memref<2x80xf32, #tpu.memory_space<vmem>>, vector<2x80xf32>,
    } else {
    }
    %c0 = arith.constant 0 : index
    %c0_1 = arith.constant 0 : index
    %c0_2 = arith.constant 0 : index
    %3 = vector.load %arg2[%c0, %c0_1, %c0_2] : memref<2x512x80xf32, #tpu.memory_space<vmem>>, vector<2x512x80xf32>
    %cst = arith.constant dense<0xFF800000> : vector<2x80xf32>
    %4 = vector.multi_reduction <maximumf>, %3, %cst [1] : vector<2x512x80xf32> to vector<2x80xf32>
    %c0_3 = arith.constant 0 : index
    %c0_4 = arith.constant 0 : index
    %5 = vector.load %arg3[%c0_3, %c0_4] : memref<2x80xf32, #tpu.memory_space<vmem>>, vector<2x80xf32>
    %6 = arith.maximumf %5, %4 : vector<2x80xf32>
    %c0_5 = arith.constant 0 : index
    %c0_6 = arith.constant 0 : index
    %7 = vector.load %arg3[%c0_5, %c0_6] : memref<2x80xf32, #tpu.memory_space<vmem>>, vector<2x80xf32>
    tpu.vector_store %arg3[%c0_5, %c0_6], %6 {strides = array<i32>} : memref<2x80xf32, #tpu.memory_space<vmem>>, vector<2x80xf32>,
    return
  }
  func.func @transform_0(%arg0: i32, %arg1: i32) -> (i32, i32, i32) {
    %c0_i32 = arith.constant 0 : i32
    %c0_i32_0 = arith.constant 0 : i32
    return %arg0, %arg1, %c0_i32 : i32, i32, i32
  }
  func.func @transform_1(%arg0: i32, %arg1: i32) -> (i32, i32) {
    %c0_i32 = arith.constant 0 : i32
    %c0_i32_0 = arith.constant 0 : i32
    return %arg0, %c0_i32 : i32, i32
  }
}

</mosaic_0001>

<bundles_post_ra>
// kernel: tpu_custom_call.1
= control target key start
LH: loop header
LB: loop body
LE: loop exit
PB: predicated region body
PF: predicated region fallthrough
CT: control target
= control target key end

     0   :  { %6 = vsyncpa [#allocation3], 0  ;;  %vm13_vm0 = vcmask 648192   ;;  %v459_v2 = vmov -inf   ;;  %vm143_vm1 = vcmask 654336   ;;  %vm413_vm2 = vcmask 1041409   ;;  %s997_s0 = inlined_call_operand.vmem [shape: f32[2,512,80], index: 0, kind: input, shape index: {}]   ;;  %s998_s1 = inlined_call_operand.hbm [shape: f32[2,80], index: 1, kind: output, shape index: {}]  }
   0x1   :  { %v15_v0 = vld [vmem:[%s997_s0] sm:$0xff]  ;;  %v16_v1 = vld [vmem:[%s997_s0 + $0x8] sm:$0xff]  ;;  %14 = vst.msk [vmem:[#allocation2] sm:$0x3] %vm13_vm0, %v459_v2  ;;  %v17_v3 = vld [vmem:[%s997_s0 + $0x10] sm:$0xff] }
   0x2   :  { %v18_v4 = vld [vmem:[%s997_s0 + $0x18] sm:$0xff]  ;;  %v19_v5 = vld [vmem:[%s997_s0 + $0x20] sm:$0xff]  ;;  %v20_v6 = vld [vmem:[%s997_s0 + $0x28] sm:$0xff]  ;;  %v144_v9 = vsel %vm143_vm1, %v15_v0, -inf  ;;  %v145_v10 = vsel %vm143_vm1, %v16_v1, -inf  ;;  %v146_v11 = vsel %vm143_vm1, %v17_v3, -inf }
   0x3   :  { %v21_v7 = vld [vmem:[%s997_s0 + $0x30] sm:$0xff]  ;;  %v22_v8 = vld [vmem:[%s997_s0 + $0x38] sm:$0xff]  ;;  %v23_v12 = vld [vmem:[%s997_s0 + $0x40] sm:$0xff]  ;;  %v147_v13 = vmax.f32 %v144_v9, %v146_v11  ;;  %v148_v14 = vsel %vm143_vm1, %v18_v4, -inf  ;;  %v150_v15 = vsel %vm143_vm1, %v19_v5, -inf  ;;  %v152_v16 = vsel %vm143_vm1, %v20_v6, -inf }
   0x4   :  { %v24_v17 = vld [vmem:[%s997_s0 + $0x48] sm:$0xff]  ;;  %v149_v18 = vmax.f32 %v145_v10, %v148_v14  ;;  %v154_v19 = vsel %vm143_vm1, %v21_v7, -inf  ;;  %v25_v20 = vld [vmem:[%s997_s0 + $0x50] sm:$0xff]  ;;  %v156_v22 = vsel %vm143_vm1, %v22_v8, -inf  ;;  %v26_v23 = vld [vmem:[%s997_s0 + $0x58] sm:$0xff]  ;;  %v158_v25 = vsel %vm143_vm1, %v23_v12, -inf }
   0x5   :  { %v151_v21 = vmax.f32 %v147_v13, %v150_v15  ;;  %v27_v26 = vld [vmem:[%s997_s0 + $0x60] sm:$0xff]  ;;  %v160_v28 = vsel %vm143_vm1, %v24_v17, -inf  ;;  %v28_v29 = vld [vmem:[%s997_s0 + $0x68] sm:$0xff]  ;;  %v162_v31 = vsel %vm143_vm1, %v25_v20, -inf  ;;  %v29_v32 = vld [vmem:[%s997_s0 + $0x70] sm:$0xff]  ;;  %v164_v34 = vsel %vm143_vm1, %v26_v23, -inf }
   0x6   :  { %v153_v24 = vmax.f32 %v149_v18, %v152_v16  ;;  %v30_v35 = vld [vmem:[%s997_s0 + $0x78] sm:$0xff]  ;;  %v166_v37 = vsel %vm143_vm1, %v27_v26, -inf  ;;  %v31_v38 = vld [vmem:[%s997_s0 + $0x80] sm:$0xff]  ;;  %v168_v40 = vsel %vm143_vm1, %v28_v29, -inf  ;;  %v32_v41 = vld [vmem:[%s997_s0 + $0x88] sm:$0xff]  ;;  %v170_v43 = vsel %vm143_vm1, %v29_v32, -inf }
   0x7   :  { %v155_v27 = vmax.f32 %v151_v21, %v154_v19  ;;  %v33_v44 = vld [vmem:[%s997_s0 + $0x90] sm:$0xff]  ;;  %v172_v46 = vsel %vm143_vm1, %v30_v35, -inf  ;;  %v34_v47 = vld [vmem:[%s997_s0 + $0x98] sm:$0xff]  ;;  %v174_v49 = vsel %vm143_vm1, %v31_v38, -inf  ;;  %v35_v50 = vld [vmem:[%s997_s0 + $0xa0] sm:$0xff]  ;;  %v176_v52 = vsel %vm143_vm1, %v32_v41, -inf }
   0x8   :  { %v157_v30 = vmax.f32 %v153_v24, %v156_v22  ;;  %v36_v53 = vld [vmem:[%s997_s0 + $0xa8] sm:$0xff]  ;;  %v178_v55 = vsel %vm143_vm1, %v33_v44, -inf  ;;  %v37_v56 = vld [vmem:[%s997_s0 + $0xb0] sm:$0xff]  ;;  %v180_v58 = vsel %vm143_vm1, %v34_v47, -inf  ;;  %v38_v59 = vld [vmem:[%s997_s0 + $0xb8] sm:$0xff]  ;;  %v182_v61 = vsel %vm143_vm1, %v35_v50, -inf }
   0x9   :  { %v159_v33 = vmax.f32 %v155_v27, %v158_v25  ;;  %v39_v62 = vld [vmem:[%s997_s0 + $0xc0] sm:$0xff]  ;;  %v40_v63 = vld [vmem:[%s997_s0 + $0xc8] sm:$0xff]  ;;  %v41_v0 = vld [vmem:[%s997_s0 + $0xd0] sm:$0xff]  ;;  %v184_v2 = vsel %vm143_vm1, %v36_v53, -inf  ;;  %v186_v5 = vsel %vm143_vm1, %v37_v56, -inf  ;;  %v188_v9 = vsel %vm143_vm1, %v38_v59, -inf }
   0xa   :  { %v161_v36 = vmax.f32 %v157_v30, %v160_v28  ;;  %v42_v3 = vld [vmem:[%s997_s0 + $0xd8] sm:$0xff]  ;;  %v43_v6 = vld [vmem:[%s997_s0 + $0xe0] sm:$0xff]  ;;  %v80_v10 = vld [vmem:[%s997_s0 + $0x208] sm:$0xff]  ;;  %v190_v14 = vsel %vm143_vm1, %v39_v62, -inf  ;;  %v192_v15 = vsel %vm143_vm1, %v40_v63, -inf  ;;  %v194_v16 = vsel %vm143_vm1, %v41_v0, -inf }
   0xb   :  { %v163_v39 = vmax.f32 %v159_v33, %v162_v31  ;;  %v79_v7 = vld [vmem:[%s997_s0 + $0x200] sm:$0xff]  ;;  %v81_v11 = vld [vmem:[%s997_s0 + $0x210] sm:$0xff]  ;;  %v82_v12 = vld [vmem:[%s997_s0 + $0x218] sm:$0xff]  ;;  %v196_v21 = vsel %vm143_vm1, %v42_v3, -inf  ;;  %v278_v23 = vsel %vm143_vm1, %v80_v10, -inf }
   0xc   :  { %v165_v42 = vmax.f32 %v161_v36, %v164_v34  ;;  %v83_v17 = vld [vmem:[%s997_s0 + $0x220] sm:$0xff]  ;;  %v84_v18 = vld [vmem:[%s997_s0 + $0x228] sm:$0xff]  ;;  %v85_v19 = vld [vmem:[%s997_s0 + $0x230] sm:$0xff]  ;;  %v277_v22 = vsel %vm143_vm1, %v79_v7, -inf  ;;  %v279_v27 = vsel %vm143_vm1, %v81_v11, -inf  ;;  %v281_v28 = vsel %vm143_vm1, %v82_v12, -inf }
   0xd   :  { %v167_v45 = vmax.f32 %v163_v39, %v166_v37  ;;  %v44_v24 = vld [vmem:[%s997_s0 + $0xe8] sm:$0xff]  ;;  %v86_v25 = vld [vmem:[%s997_s0 + $0x238] sm:$0xff]  ;;  %v283_v29 = vsel %vm143_vm1, %v83_v17, -inf  ;;  %v45_v30 = vld [vmem:[%s997_s0 + $0xf0] sm:$0xff]  ;;  %v280_v34 = vmax.f32 %v277_v22, %v279_v27  ;;  %v282_v35 = vmax.f32 %v278_v23, %v281_v28 }
   0xe   :  { %v169_v48 = vmax.f32 %v165_v42, %v168_v40  ;;  %v87_v31 = vld [vmem:[%s997_s0 + $0x240] sm:$0xff]  ;;  %v88_v32 = vld [vmem:[%s997_s0 + $0x248] sm:$0xff]  ;;  %v285_v36 = vsel %vm143_vm1, %v84_v18, -inf  ;;  %v46_v37 = vld [vmem:[%s997_s0 + $0xf8] sm:$0xff]  ;;  %v198_v39 = vsel %vm143_vm1, %v43_v6, -inf  ;;  %v287_v40 = vsel %vm143_vm1, %v85_v19, -inf }
   0xf   :  { %v171_v51 = vmax.f32 %v167_v45, %v170_v43  ;;  %v289_v41 = vsel %vm143_vm1, %v86_v25, -inf  ;;  %v47_v42 = vld [vmem:[%s997_s0 + $0x100] sm:$0xff]  ;;  %v89_v43 = vld [vmem:[%s997_s0 + $0x250] sm:$0xff]  ;;  %v90_v44 = vld [vmem:[%s997_s0 + $0x258] sm:$0xff]  ;;  %v284_v47 = vmax.f32 %v280_v34, %v283_v29  ;;  %v293_v53 = vsel %vm143_vm1, %v88_v32, -inf }
  0x10   :  { %v173_v54 = vmax.f32 %v169_v48, %v172_v46  ;;  %v200_v46 = vsel %vm143_vm1, %v44_v24, -inf  ;;  %v286_v48 = vmax.f32 %v282_v35, %v285_v36  ;;  %v92_v56 = vld [vmem:[%s997_s0 + $0x268] sm:$0xff]  ;;  %v206_v63 = vsel %vm143_vm1, %v47_v42, -inf  ;;  %v93_v3 = vld [vmem:[%s997_s0 + $0x270] sm:$0xff]  ;;  %v98_v28 = vld [vmem:[%s997_s0 + $0x298] sm:$0xff] }
  0x11   :  { %v175_v57 = vmax.f32 %v171_v51, %v174_v49  ;;  %v48_v49 = vld [vmem:[%s997_s0 + $0x108] sm:$0xff]  ;;  %v202_v51 = vsel %vm143_vm1, %v45_v30, -inf  ;;  %v288_v59 = vmax.f32 %v284_v47, %v287_v40  ;;  %v295_v0 = vsel %vm143_vm1, %v89_v43, -inf  ;;  %v97_v27 = vld [vmem:[%s997_s0 + $0x290] sm:$0xff] }
  0x12   :  { %v177_v60 = vmax.f32 %v173_v54, %v176_v52  ;;  %v291_v52 = vsel %vm143_vm1, %v87_v31, -inf  ;;  %v49_v54 = vld [vmem:[%s997_s0 + $0x110] sm:$0xff]  ;;  %v208_v6 = vsel %vm143_vm1, %v48_v49, -inf  ;;  %v303_v24 = vsel %vm143_vm1, %v93_v3, -inf  ;;  %v100_v40 = vld [vmem:[%s997_s0 + $0x2a8] sm:$0xff] }
  0x13   :  { %v179_v1 = vmax.f32 %v175_v57, %v178_v55  ;;  %v91_v55 = vld [vmem:[%s997_s0 + $0x260] sm:$0xff]  ;;  %v292_v7 = vmax.f32 %v288_v59, %v291_v52  ;;  %v210_v11 = vsel %vm143_vm1, %v49_v54, -inf  ;;  %v313_v49 = vsel %vm143_vm1, %v98_v28, -inf  ;;  %v102_v52 = vld [vmem:[%s997_s0 + $0x2b8] sm:$0xff] }
  0x14   :  { %v181_v4 = vmax.f32 %v177_v60, %v180_v58  ;;  %v204_v58 = vsel %vm143_vm1, %v46_v37, -inf  ;;  %v290_v60 = vmax.f32 %v286_v48, %v289_v41  ;;  %v299_v12 = vsel %vm143_vm1, %v91_v55, -inf }
  0x15   :  { %v183_v8 = vmax.f32 %v179_v1, %v182_v61  ;;  %v50_v61 = vld [vmem:[%s997_s0 + $0x118] sm:$0xff]  ;;  %v297_v1 = vsel %vm143_vm1, %v90_v44, -inf  ;;  %v296_v19 = vmax.f32 %v292_v7, %v295_v0  ;;  %v311_v48 = vsel %vm143_vm1, %v97_v27, -inf  ;;  %v104_v0 = vld [vmem:[%s997_s0 + $0x2c8] sm:$0xff] }
  0x16   :  { %v185_v13 = vmax.f32 %v181_v4, %v184_v2  ;;  %v51_v2 = vld [vmem:[%s997_s0 + $0x120] sm:$0xff]  ;;  %v94_v4 = vld [vmem:[%s997_s0 + $0x278] sm:$0xff]  ;;  %v212_v18 = vsel %vm143_vm1, %v50_v61, -inf  ;;  %v317_v61 = vsel %vm143_vm1, %v100_v40, -inf }
  0x17   :  { %v187_v20 = vmax.f32 %v183_v8, %v186_v5  ;;  %v294_v8 = vmax.f32 %v290_v60, %v293_v53  ;;  %v214_v23 = vsel %vm143_vm1, %v51_v2, -inf  ;;  %v305_v25 = vsel %vm143_vm1, %v94_v4, -inf }
  0x18   :  { %v189_v26 = vmax.f32 %v185_v13, %v188_v9  ;;  %v52_v9 = vld [vmem:[%s997_s0 + $0x128] sm:$0xff]  ;;  %v301_v13 = vsel %vm143_vm1, %v92_v56, -inf  ;;  %v300_v31 = vmax.f32 %v296_v19, %v299_v12  ;;  %v106_v12 = vld [vmem:[%s997_s0 + $0x2d8] sm:$0xff] }
  0x19   :  { %v191_v33 = vmax.f32 %v187_v20, %v190_v14  ;;  %v53_v14 = vld [vmem:[%s997_s0 + $0x130] sm:$0xff]  ;;  %v298_v20 = vmax.f32 %v294_v8, %v297_v1  ;;  %v216_v30 = vsel %vm143_vm1, %v52_v9, -inf  ;;  %v321_v9 = vsel %vm143_vm1, %v102_v52, -inf }
  0x1a   :  { %v193_v38 = vmax.f32 %v189_v26, %v192_v15  ;;  %v95_v15 = vld [vmem:[%s997_s0 + $0x280] sm:$0xff]  ;;  %v218_v35 = vsel %vm143_vm1, %v53_v14, -inf  ;;  %v304_v43 = vmax.f32 %v300_v31, %v303_v24  ;;  %v108_v24 = vld [vmem:[%s997_s0 + $0x2e8] sm:$0xff] }
  0x1b   :  { %v195_v45 = vmax.f32 %v191_v33, %v194_v16  ;;  %v96_v16 = vld [vmem:[%s997_s0 + $0x288] sm:$0xff]  ;;  %v55_v26 = vld [vmem:[%s997_s0 + $0x140] sm:$0xff]  ;;  %v302_v32 = vmax.f32 %v298_v20, %v301_v13  ;;  %v307_v36 = vsel %vm143_vm1, %v95_v15, -inf }
  0x1c   :  { %v197_v50 = vmax.f32 %v193_v38, %v196_v21  ;;  %v54_v21 = vld [vmem:[%s997_s0 + $0x138] sm:$0xff]  ;;  %v56_v33 = vld [vmem:[%s997_s0 + $0x148] sm:$0xff]  ;;  %v309_v37 = vsel %vm143_vm1, %v96_v16, -inf  ;;  %v57_v38 = vld [vmem:[%s997_s0 + $0x150] sm:$0xff]  ;;  %v222_v47 = vsel %vm143_vm1, %v55_v26, -inf  ;;  %v308_v55 = vmax.f32 %v304_v43, %v307_v36 }
  0x1d   :  { %v199_v57 = vmax.f32 %v195_v45, %v198_v39  ;;  %v99_v39 = vld [vmem:[%s997_s0 + $0x2a0] sm:$0xff]  ;;  %v220_v42 = vsel %vm143_vm1, %v54_v21, -inf  ;;  %v306_v44 = vmax.f32 %v302_v32, %v305_v25  ;;  %v58_v45 = vld [vmem:[%s997_s0 + $0x158] sm:$0xff]  ;;  %v224_v54 = vsel %vm143_vm1, %v56_v33, -inf }
  0x1e   :  { %v201_v62 = vmax.f32 %v197_v50, %v200_v46  ;;  %v59_v50 = vld [vmem:[%s997_s0 + $0x160] sm:$0xff]  ;;  %v226_v59 = vsel %vm143_vm1, %v57_v38, -inf  ;;  %v315_v60 = vsel %vm143_vm1, %v99_v39, -inf  ;;  %v228_v2 = vsel %vm143_vm1, %v58_v45, -inf  ;;  %v110_v36 = vld [vmem:[%s997_s0 + $0x2f8] sm:$0xff] }
  0x1f   :  { %v203_v5 = vmax.f32 %v199_v57, %v202_v51  ;;  %v101_v51 = vld [vmem:[%s997_s0 + $0x2b0] sm:$0xff]  ;;  %v310_v56 = vmax.f32 %v306_v44, %v309_v37  ;;  %v60_v57 = vld [vmem:[%s997_s0 + $0x168] sm:$0xff]  ;;  %v312_v3 = vmax.f32 %v308_v55, %v311_v48  ;;  %v230_v7 = vsel %vm143_vm1, %v59_v50, -inf }
  0x20   :  { %v205_v10 = vmax.f32 %v201_v62, %v204_v58  ;;  %v61_v62 = vld [vmem:[%s997_s0 + $0x170] sm:$0xff]  ;;  %v319_v8 = vsel %vm143_vm1, %v101_v51, -inf  ;;  %v232_v14 = vsel %vm143_vm1, %v60_v57, -inf  ;;  %v325_v21 = vsel %vm143_vm1, %v104_v0, -inf  ;;  %v112_v48 = vld [vmem:[%s997_s0 + $0x308] sm:$0xff] }
  0x21   :  { %v207_v17 = vmax.f32 %v203_v5, %v206_v63  ;;  %v103_v63 = vld [vmem:[%s997_s0 + $0x2c0] sm:$0xff]  ;;  %v314_v4 = vmax.f32 %v310_v56, %v313_v49  ;;  %v62_v5 = vld [vmem:[%s997_s0 + $0x178] sm:$0xff]  ;;  %v316_v15 = vmax.f32 %v312_v3, %v315_v60  ;;  %v234_v19 = vsel %vm143_vm1, %v61_v62, -inf }
  0x22   :  { %v209_v22 = vmax.f32 %v205_v10, %v208_v6  ;;  %v63_v10 = vld [vmem:[%s997_s0 + $0x180] sm:$0xff]  ;;  %v323_v20 = vsel %vm143_vm1, %v103_v63, -inf  ;;  %v236_v26 = vsel %vm143_vm1, %v62_v5, -inf  ;;  %v329_v33 = vsel %vm143_vm1, %v106_v12, -inf  ;;  %v114_v60 = vld [vmem:[%s997_s0 + $0x318] sm:$0xff]  ;;  %v73_v12 = vld [vmem:[%s997_s0 + $0x1d0] sm:$0xff] }
  0x23   :  { %v211_v29 = vmax.f32 %v207_v17, %v210_v11  ;;  %v105_v11 = vld [vmem:[%s997_s0 + $0x2d0] sm:$0xff]  ;;  %v318_v16 = vmax.f32 %v314_v4, %v317_v61  ;;  %v64_v17 = vld [vmem:[%s997_s0 + $0x188] sm:$0xff]  ;;  %v320_v27 = vmax.f32 %v316_v15, %v319_v8  ;;  %v238_v31 = vsel %vm143_vm1, %v63_v10, -inf }
  0x24   :  { %v213_v34 = vmax.f32 %v209_v22, %v212_v18  ;;  %v65_v22 = vld [vmem:[%s997_s0 + $0x190] sm:$0xff]  ;;  %v327_v32 = vsel %vm143_vm1, %v105_v11, -inf  ;;  %v240_v38 = vsel %vm143_vm1, %v64_v17, -inf  ;;  %v333_v45 = vsel %vm143_vm1, %v108_v24, -inf  ;;  %v74_v17 = vld [vmem:[%s997_s0 + $0x1d8] sm:$0xff] }
  0x25   :  { %v215_v41 = vmax.f32 %v211_v29, %v214_v23  ;;  %v107_v23 = vld [vmem:[%s997_s0 + $0x2e0] sm:$0xff]  ;;  %v322_v28 = vmax.f32 %v318_v16, %v321_v9  ;;  %v66_v29 = vld [vmem:[%s997_s0 + $0x198] sm:$0xff]  ;;  %v324_v39 = vmax.f32 %v320_v27, %v323_v20  ;;  %v242_v43 = vsel %vm143_vm1, %v65_v22, -inf }
  0x26   :  { %v217_v46 = vmax.f32 %v213_v34, %v216_v30  ;;  %v67_v34 = vld [vmem:[%s997_s0 + $0x1a0] sm:$0xff]  ;;  %v331_v44 = vsel %vm143_vm1, %v107_v23, -inf  ;;  %v244_v50 = vsel %vm143_vm1, %v66_v29, -inf  ;;  %v337_v57 = vsel %vm143_vm1, %v110_v36, -inf }
  0x27   :  { %v219_v53 = vmax.f32 %v215_v41, %v218_v35  ;;  %v109_v35 = vld [vmem:[%s997_s0 + $0x2f0] sm:$0xff]  ;;  %v326_v40 = vmax.f32 %v322_v28, %v325_v21  ;;  %v68_v41 = vld [vmem:[%s997_s0 + $0x1a8] sm:$0xff]  ;;  %v328_v51 = vmax.f32 %v324_v39, %v327_v32  ;;  %v246_v55 = vsel %vm143_vm1, %v67_v34, -inf  ;;  %v119_v27 = vld [vmem:[%s997_s0 + $0x340] sm:$0xff] }
  0x28   :  { %v221_v58 = vmax.f32 %v217_v46, %v220_v42  ;;  %v69_v46 = vld [vmem:[%s997_s0 + $0x1b0] sm:$0xff]  ;;  %v335_v56 = vsel %vm143_vm1, %v109_v35, -inf  ;;  %v248_v62 = vsel %vm143_vm1, %v68_v41, -inf  ;;  %v341_v5 = vsel %vm143_vm1, %v112_v48, -inf  ;;  %v120_v28 = vld [vmem:[%s997_s0 + $0x348] sm:$0xff] }
  0x29   :  { %v223_v1 = vmax.f32 %v219_v53, %v222_v47  ;;  %v111_v47 = vld [vmem:[%s997_s0 + $0x300] sm:$0xff]  ;;  %v330_v52 = vmax.f32 %v326_v40, %v329_v33  ;;  %v70_v53 = vld [vmem:[%s997_s0 + $0x1b8] sm:$0xff]  ;;  %v332_v63 = vmax.f32 %v328_v51, %v331_v44  ;;  %v250_v3 = vsel %vm143_vm1, %v69_v46, -inf  ;;  %v121_v39 = vld [vmem:[%s997_s0 + $0x350] sm:$0xff] }
  0x2a   :  { %v225_v6 = vmax.f32 %v221_v58, %v224_v54  ;;  %v71_v58 = vld [vmem:[%s997_s0 + $0x1c0] sm:$0xff]  ;;  %v339_v4 = vsel %vm143_vm1, %v111_v47, -inf  ;;  %v252_v9 = vsel %vm143_vm1, %v70_v53, -inf  ;;  %v345_v16 = vsel %vm143_vm1, %v114_v60, -inf  ;;  %v122_v40 = vld [vmem:[%s997_s0 + $0x358] sm:$0xff]  ;;  %v124_v46 = vld [vmem:[%s997_s0 + $0x368] sm:$0xff] }
  0x2b   :  { %v227_v13 = vmax.f32 %v223_v1, %v226_v59  ;;  %v113_v59 = vld [vmem:[%s997_s0 + $0x310] sm:$0xff]  ;;  %v334_v0 = vmax.f32 %v330_v52, %v333_v45  ;;  %v72_v1 = vld [vmem:[%s997_s0 + $0x1c8] sm:$0xff]  ;;  %v336_v10 = vmax.f32 %v332_v63, %v335_v56  ;;  %v75_v33 = vld [vmem:[%s997_s0 + $0x1e0] sm:$0xff]  ;;  %v260_v35 = vsel %vm143_vm1, %v74_v17, -inf }
  0x2c   :  { %v229_v18 = vmax.f32 %v225_v6, %v228_v2  ;;  %v115_v6 = vld [vmem:[%s997_s0 + $0x320] sm:$0xff]  ;;  %v343_v15 = vsel %vm143_vm1, %v113_v59, -inf  ;;  %v256_v21 = vsel %vm143_vm1, %v72_v1, -inf  ;;  %v357_v44 = vsel %vm143_vm1, %v120_v28, -inf  ;;  %v77_v51 = vld [vmem:[%s997_s0 + $0x1f0] sm:$0xff]  ;;  %v78_v56 = vld [vmem:[%s997_s0 + $0x1f8] sm:$0xff] }
  0x2d   :  { %v231_v25 = vmax.f32 %v227_v13, %v230_v7  ;;  %v116_v7 = vld [vmem:[%s997_s0 + $0x328] sm:$0xff]  ;;  %v338_v11 = vmax.f32 %v334_v0, %v337_v57  ;;  %v340_v22 = vmax.f32 %v336_v10, %v339_v4  ;;  %v123_v45 = vld [vmem:[%s997_s0 + $0x360] sm:$0xff]  ;;  %v262_v52 = vsel %vm143_vm1, %v75_v33, -inf  ;;  %v125_v57 = vld [vmem:[%s997_s0 + $0x370] sm:$0xff] }
  0x2e   :  { %v233_v30 = vmax.f32 %v229_v18, %v232_v14  ;;  %v254_v14 = vsel %vm143_vm1, %v71_v58, -inf  ;;  %v117_v18 = vld [vmem:[%s997_s0 + $0x330] sm:$0xff]  ;;  %v126_v58 = vld [vmem:[%s997_s0 + $0x378] sm:$0xff]  ;;  %v127_v63 = vld [vmem:[%s997_s0 + $0x380] sm:$0xff] }
  0x2f   :  { %v235_v37 = vmax.f32 %v231_v25, %v234_v19  ;;  %v118_v19 = vld [vmem:[%s997_s0 + $0x338] sm:$0xff]  ;;  %v342_v23 = vmax.f32 %v338_v11, %v341_v5  ;;  %v347_v25 = vsel %vm143_vm1, %v115_v6, -inf  ;;  %v351_v36 = vsel %vm143_vm1, %v117_v18, -inf  ;;  %v128_v0 = vld [vmem:[%s997_s0 + $0x388] sm:$0xff] }
  0x30   :  { %v237_v42 = vmax.f32 %v233_v30, %v236_v26  ;;  %v349_v26 = vsel %vm143_vm1, %v116_v7, -inf  ;;  %v258_v30 = vsel %vm143_vm1, %v73_v12, -inf  ;;  %v266_v5 = vsel %vm143_vm1, %v77_v51, -inf  ;;  %v130_v10 = vld [vmem:[%s997_s0 + $0x398] sm:$0xff] }
  0x31   :  { %v239_v49 = vmax.f32 %v235_v37, %v238_v31  ;;  %v344_v31 = vmax.f32 %v340_v22, %v343_v15  ;;  %v346_v32 = vmax.f32 %v342_v23, %v345_v16  ;;  %v353_v37 = vsel %vm143_vm1, %v118_v19, -inf  ;;  %v131_v15 = vld [vmem:[%s997_s0 + $0x3a0] sm:$0xff]  ;;  %v132_v16 = vld [vmem:[%s997_s0 + $0x3a8] sm:$0xff]  ;;  %v133_v23 = vld [vmem:[%s997_s0 + $0x3b0] sm:$0xff] }
  0x32   :  { %v241_v54 = vmax.f32 %v237_v42, %v240_v38  ;;  %v76_v38 = vld [vmem:[%s997_s0 + $0x1e8] sm:$0xff]  ;;  %v268_v6 = vsel %vm143_vm1, %v78_v56, -inf  ;;  %v367_v7 = vsel %vm143_vm1, %v125_v57, -inf  ;;  %v377_v22 = vsel %vm143_vm1, %v130_v10, -inf }
  0x33   :  { %v243_v61 = vmax.f32 %v239_v49, %v242_v43  ;;  %v348_v41 = vmax.f32 %v344_v31, %v347_v25  ;;  %v350_v42 = vmax.f32 %v346_v32, %v349_v26  ;;  %v355_v43 = vsel %vm143_vm1, %v119_v27, -inf }
  0x34   :  { %v245_v2 = vmax.f32 %v241_v54, %v244_v50  ;;  %v264_v53 = vsel %vm143_vm1, %v76_v38, -inf  ;;  %v359_v54 = vsel %vm143_vm1, %v121_v39, -inf  ;;  %v379_v27 = vsel %vm143_vm1, %v131_v15, -inf }
  0x35   :  { %v247_v8 = vmax.f32 %v243_v61, %v246_v55  ;;  %v352_v49 = vmax.f32 %v348_v41, %v351_v36  ;;  %v354_v50 = vmax.f32 %v350_v42, %v353_v37  ;;  %v361_v55 = vsel %vm143_vm1, %v122_v40, -inf  ;;  %v137_v36 = vld [vmem:[%s997_s0 + $0x3d0] sm:$0xff]  ;;  %v138_v37 = vld [vmem:[%s997_s0 + $0x3d8] sm:$0xff]  ;;  %v139_v42 = vld [vmem:[%s997_s0 + $0x3e0] sm:$0xff] }
  0x36   :  { %v249_v13 = vmax.f32 %v245_v2, %v248_v62  ;;  %v363_v61 = vsel %vm143_vm1, %v123_v45, -inf  ;;  %v365_v62 = vsel %vm143_vm1, %v124_v46, -inf  ;;  %v381_v28 = vsel %vm143_vm1, %v132_v16, -inf }
  0x37   :  { %v251_v20 = vmax.f32 %v247_v8, %v250_v3  ;;  %v356_v59 = vmax.f32 %v352_v49, %v355_v43  ;;  %v358_v60 = vmax.f32 %v354_v50, %v357_v44  ;;  %v369_v8 = vsel %vm143_vm1, %v126_v58, -inf  ;;  %v140_v43 = vld [vmem:[%s997_s0 + $0x3e8] sm:$0xff]  ;;  %v141_v49 = vld [vmem:[%s997_s0 + $0x3f0] sm:$0xff]  ;;  %v142_v50 = vld [vmem:[%s997_s0 + $0x3f8] sm:$0xff] }
  0x38   :  { %v253_v24 = vmax.f32 %v249_v13, %v252_v9  ;;  %v129_v9 = vld [vmem:[%s997_s0 + $0x390] sm:$0xff]  ;;  %v371_v13 = vsel %vm143_vm1, %v127_v63, -inf  ;;  %v399_v58 = vsel %vm143_vm1, %v141_v49, -inf }
  0x39   :  { %v255_v29 = vmax.f32 %v251_v20, %v254_v14  ;;  %v360_v3 = vmax.f32 %v356_v59, %v359_v54  ;;  %v362_v4 = vmax.f32 %v358_v60, %v361_v55  ;;  %v373_v14 = vsel %vm143_vm1, %v128_v0, -inf }
  0x3a   :  { %v257_v34 = vmax.f32 %v253_v24, %v256_v21  ;;  %v375_v21 = vsel %vm143_vm1, %v129_v9, -inf  ;;  %v134_v24 = vld [vmem:[%s997_s0 + $0x3b8] sm:$0xff]  ;;  %v397_v54 = vsel %vm143_vm1, %v140_v43, -inf  ;;  %v401_v59 = vsel %vm143_vm1, %v142_v50, -inf }
  0x3b   :  { %v259_v47 = vmax.f32 %v255_v29, %v258_v30  ;;  %v364_v11 = vmax.f32 %v360_v3, %v363_v61  ;;  %v366_v12 = vmax.f32 %v362_v4, %v365_v62  ;;  %v135_v29 = vld [vmem:[%s997_s0 + $0x3c0] sm:$0xff]  ;;  %v136_v30 = vld [vmem:[%s997_s0 + $0x3c8] sm:$0xff]  ;;  %s460_s0 = smov [#allocation2]  }
  0x3c   :  { %v261_v48 = vmax.f32 %v257_v34, %v260_v35  ;;  %v383_v34 = vsel %vm143_vm1, %v133_v23, -inf  ;;  %v385_v35 = vsel %vm143_vm1, %v134_v24, -inf  ;;  %v387_v40 = vsel %vm143_vm1, %v135_v29, -inf  ;;  %s425_s30 = sshll.u32 %s460_s0, 4  ;;  %s426_s30 = int_to_ptr.vmem [resolvable:$true] %s425_s30 }
  0x3d   :  { %v263_v1 = vmax.f32 %v259_v47, %v262_v52  ;;  %v368_v19 = vmax.f32 %v364_v11, %v367_v7  ;;  %v370_v20 = vmax.f32 %v366_v12, %v369_v8  ;;  %v389_v41 = vsel %vm143_vm1, %v136_v30, -inf  ;;  %v410_v11 = vld [vmem:[#allocation2] sm:$0x3]  ;;  %s435_s2 = scalar_lea.vmem %s426_s30, 32  ;;  %p440_p1 = scmp.lt.s32.totalorder %s426_s30, %s426_s30 }
  0x3e   :  { %v265_v2 = vmax.f32 %v261_v48, %v264_v53  ;;  %v391_v47 = vsel %vm143_vm1, %v137_v36, -inf  ;;  %v393_v48 = vsel %vm143_vm1, %v138_v37, -inf  ;;  %v395_v53 = vsel %vm143_vm1, %v139_v42, -inf  ;;  %p436_p0 = scmp.ne.s32.totalorder %s426_s30, %s435_s2  ;;  %p441_p2 = scmp.lt.s32.totalorder %s435_s2, %s435_s2 }
  0x3f   :  { %v267_v17 = vmax.f32 %v263_v1, %v266_v5  ;;  %v372_v25 = vmax.f32 %v368_v19, %v371_v13  ;;  %v374_v26 = vmax.f32 %v370_v20, %v373_v14 }
  0x40   :  { %v269_v18 = vmax.f32 %v265_v2, %v268_v6  ;;  %p442_p3 = por %p441_p2, %p440_p1 }
  0x41   :  { %v376_v32 = vmax.f32 %v372_v25, %v375_v21  ;;  %v378_v33 = vmax.f32 %v374_v26, %v377_v22 }
  0x42   :  { %v270_v31 = vmax.f32 %v267_v17, %v269_v18  ;;  %p443_p4 = pnand %p442_p3, %p436_p0 }
  0x43   :  { %v380_v38 = vmax.f32 %v376_v32, %v379_v27  ;;  %v382_v39 = vmax.f32 %v378_v33, %v381_v28 }
  0x44   :  { %v271_v44 = vrot.slane %v270_v31, 4 }
  0x45   :  { %v384_v45 = vmax.f32 %v380_v38, %v383_v34  ;;  %v386_v46 = vmax.f32 %v382_v39, %v385_v35 }
  0x46   :  { %v272_v55 = vmax.f32 %v270_v31, %v271_v44 }
  0x47   :  { %v388_v51 = vmax.f32 %v384_v45, %v387_v40  ;;  %v390_v52 = vmax.f32 %v386_v46, %v389_v41 }
  0x48   :  { %v273_v62 = vrot.slane %v272_v55, 2 }
  0x49   :  { %v392_v56 = vmax.f32 %v388_v51, %v391_v47  ;;  %v394_v57 = vmax.f32 %v390_v52, %v393_v48 }
  0x4a   :  { %v274_v2 = vmax.f32 %v272_v55, %v273_v62 }
  0x4b   :  { %v396_v60 = vmax.f32 %v392_v56, %v395_v53  ;;  %v398_v61 = vmax.f32 %v394_v57, %v397_v54 }
  0x4c   :  { %v275_v5 = vrot.slane %v274_v2, 1 }
  0x4d   :  { %v400_v63 = vmax.f32 %v396_v60, %v399_v58  ;;  %v402_v0 = vmax.f32 %v398_v61, %v401_v59 }
  0x4e   :  { %v276_v8 = vmax.f32 %v274_v2, %v275_v5 }
  0x4f   :  { %v403_v1 = vmax.f32 %v400_v63, %v402_v0 }
  0x51   :  { %v404_v3 = vrot.slane %v403_v1, 4 }
  0x53   :  { %v405_v4 = vmax.f32 %v403_v1, %v404_v3 }
  0x55   :  { %v406_v6 = vrot.slane %v405_v4, 2 }
  0x57   :  { %v407_v7 = vmax.f32 %v405_v4, %v406_v6 }
  0x59   :  { %v408_v9 = vrot.slane %v407_v7, 1 }
  0x5b   :  { %v409_v10 = vmax.f32 %v407_v7, %v408_v9 }
  0x5d   :  { %v414_v12 = vsel %vm413_vm2, %v409_v10, %v276_v8 }
  0x5e   :  { %v416_v13 = vmax.f32 %v410_v11, %v414_v12 }
  0x60   :  { %418 = vst.msk [vmem:[#allocation2] sm:$0x3] %vm13_vm0, %v416_v13 }
  0x61   :  { %446 = shalt.err (!%p443_p4)
}
  0x62   :  { %s447_s5 = scalar_lea.hbm %s998_s1, 32 }
  0x63   :  { %p448_p5 = scmp.ne.s32.totalorder %s998_s1, %s447_s5  ;;  %p451_p6 = scmp.lt.u32.totalorder %s447_s5, %s998_s1 }
  0x65   :  { %p453_p7 = pnand %p451_p6, %p448_p5 }
  0x67   :  { %456 = shalt.err (!%p453_p7)
}
  0x68   :  { %428 = dma.vmem_to_hbm [thread:$0]  %s426_s30, 32, %s998_s1, [#allocation3]  }
  0x69   :  { %457 = dma.done.wait [#allocation3], 32  }
  0x6a   :  { %458 = vsyncadd [#allocation3], 4294967264 }
  0x6b   :  { %432 = vsyncpa [#allocation3], 1 }

</bundles_post_ra>
